<compile_context>
chip_gen: v7x
topology: tpu7x:2x2x1
jax: 0.10.0
libtpu: 0.0.40
codegen_flags: <defaults>
</compile_context>

<pallas_src>
import jax
import jax.numpy as jnp
from jax.experimental import pallas as pl
from jax.experimental.pallas import tpu as pltpu


def tower_kernel(x_ref, w1_ref, b1_ref, w2_ref, b2_ref, o_ref):
    # First linear (MXU) + bias + ReLU (VPU): (TILE_B, D) @ (D, H) -> (TILE_B, H), f32 acc.
    h = jnp.dot(x_ref[...], w1_ref[...], preferred_element_type=jnp.float32)
    h = jnp.maximum(h + b1_ref[...], 0.0)

    # Second linear H -> 1 as VPU multiply + XLU lane reduce (avoids an N=1 MXU matmul).
    logit = jnp.sum(h * w2_ref[...], axis=-1) + b2_ref[0]          # (TILE_B,) f32
    o_ref[...] = jax.nn.sigmoid(logit)[None, :].astype(o_ref.dtype)


def _round_up(a, m):
    return (a + m - 1) // m * m


def _choose_tiling(B, D, itemsize, tile_b=None):
    """Pick (tile_b_eff, num_tiles).  tile_b_eff is a multiple of 128 when >1 tile."""
    sub = 8 if itemsize >= 4 else 16                    # sublane granule for this dtype
    if tile_b is not None:
        if tile_b >= B:
            return _round_up(B, sub), 1
        if tile_b % 128 != 0:
            raise ValueError("tile_b must be a multiple of 128 for multi-tile grids")
        return tile_b, pl.cdiv(B, tile_b)

    lane_d = max(_round_up(D, 128), 128)                # lane-padded row width in VMEM
    # Target ~2 MiB of actual HBM x-bytes per grid step (per-step overhead ~0.35 us);
    # cap a single x buffer at 8 MiB so 2x x-buffers + 2x weights + out fit v7x VMEM.
    tile = (2 << 20) // max(D * itemsize, 1)
    tile = min(tile, (8 << 20) // (lane_d * itemsize))
    tile = max(128, (tile // 128) * 128)

    if B <= tile:
        if B >= 256:
            # Force >= 2 grid steps so the "parallel" batch axis engages both
            # TensorCores on v7x (harmless on single-TC v5e/v6e).
            half = _round_up(pl.cdiv(B, 2), 128)
            return half, pl.cdiv(B, half)
        return _round_up(B, sub), 1
    return tile, pl.cdiv(B, tile)


def tower_net(x, w1, b1, w2, b2, *, tile_b=None, stream_bf16=False):
    """x: (B, D) -> (B, 1) float32, matching nn.Sequential(Linear, ReLU, Linear, Sigmoid).

    tile_b:      optional override of batch rows per grid step (auto-sized otherwise).
    stream_bf16: stream x / W1 in bfloat16 (f32 MXU accumulation, f32 tail) — roughly
                 halves the dominant HBM traffic on this memory-bound kernel.
    """
    B, D = x.shape
    H = w1.shape[1]

    if stream_bf16:
        x = x.astype(jnp.bfloat16)
        w1 = w1.astype(jnp.bfloat16)
    x_item = x.dtype.itemsize
    w_item = w1.dtype.itemsize

    tile_b_eff, num_tiles = _choose_tiling(B, D, x_item, tile_b)
    b_pad = num_tiles * tile_b_eff          # output slab only; x is NOT padded/copied

    # Params in kernel-friendly layouts: (1, H) rows for the lane-wise ops, SMEM scalar b2.
    b1_row = b1.reshape(1, H).astype(jnp.float32)
    w2_row = w2.reshape(1, H).astype(jnp.float32)
    b2_s = b2.reshape(1).astype(jnp.float32)

    # --- Explicit VMEM budget (lane/sublane padded), sets vmem_limit_bytes. ---
    lane_d = max(_round_up(D, 128), 128)
    lane_h = max(_round_up(H, 128), 128)
    x_buf = tile_b_eff * lane_d * x_item                        # one x tile buffer
    w1_buf = _round_up(D, 16) * lane_h * w_item                 # resident W1
    small_buf = 2 * 8 * lane_h * 4                              # b1 + w2 rows
    out_buf = 8 * max(_round_up(tile_b_eff, 128), 128) * 4      # (1, TILE_B) slab
    h_scratch = 2 * tile_b_eff * lane_h * 4                     # h + elementwise temps
    footprint = 2 * x_buf + 2 * (w1_buf + small_buf) + 2 * out_buf + h_scratch
    vmem_limit = int(min(max(footprint + (4 << 20), 16 << 20), 56 << 20))

    cost = pl.CostEstimate(
        flops=2 * B * D * H + 4 * B * H,
        transcendentals=B,                                      # sigmoid
        bytes_accessed=B * D * x_item + D * H * w_item + 4 * (2 * H + 1) + 4 * b_pad,
    )

    out = pl.pallas_call(
        tower_kernel,
        out_shape=jax.ShapeDtypeStruct((1, b_pad), jnp.float32),
        grid=(num_tiles,),
        in_specs=[
            pl.BlockSpec((tile_b_eff, D), lambda i: (i, 0)),    # x: tiled over batch
            pl.BlockSpec((D, H), lambda i: (0, 0)),             # W1: resident in VMEM
            pl.BlockSpec((1, H), lambda i: (0, 0)),             # b1: resident
            pl.BlockSpec((1, H), lambda i: (0, 0)),             # w2 row: resident
            pl.BlockSpec(memory_space=pltpu.MemorySpace.SMEM),  # b2 scalar in SMEM
        ],
        out_specs=pl.BlockSpec((1, tile_b_eff), lambda i: (0, i)),  # lane-dense row
        compiler_params=pltpu.CompilerParams(
            dimension_semantics=("parallel",),   # both TCs on v7x; no-op on v5e/v6e
            vmem_limit_bytes=vmem_limit,
        ),
        cost_estimate=cost,
    )(x, w1, b1_row, w2_row, b2_s)

    # (1, B_pad) lane-dense slab -> (B, 1) column; padded columns (garbage from the
    # partial last x block) are dropped here and never read downstream.
    return out.reshape(b_pad, 1)[:B]


def init_params(key, input_dim, hidden_dim):
    """Deterministic PyTorch-style uniform(-1/sqrt(fan_in), 1/sqrt(fan_in)) init."""
    k1, k2, k3, k4 = jax.random.split(key, 4)
    bound1 = 1.0 / jnp.sqrt(jnp.float32(input_dim))
    bound2 = 1.0 / jnp.sqrt(jnp.float32(hidden_dim))
    w1 = jax.random.uniform(k1, (input_dim, hidden_dim), jnp.float32, -bound1, bound1)
    b1 = jax.random.uniform(k2, (1, hidden_dim), jnp.float32, -bound1, bound1)
    w2 = jax.random.uniform(k3, (hidden_dim, 1), jnp.float32, -bound2, bound2)
    b2 = jax.random.uniform(k4, (1, 1), jnp.float32, -bound2, bound2)
    return w1, b1, w2, b2


def tower_ref(x, w1, b1, w2, b2):
    """Pure-JAX reference for correctness check."""
    h = jnp.maximum(x @ w1 + b1, 0.0)
    return jax.nn.sigmoid(h @ w2 + b2)


if __name__ == "__main__":
    key = jax.random.PRNGKey(0)

    # --- Small case matching the module spec (single tile, full-array block). ---
    batch, input_dim, hidden_dim = 8, 32, 32
    kx, kp, kx2 = jax.random.split(key, 3)
    x = jax.random.normal(kx, (batch, input_dim), jnp.float32)
    w1, b1, w2, b2 = init_params(kp, input_dim, hidden_dim)

    out = tower_net(x, w1, b1, w2, b2)
    out = jax.block_until_ready(out)
    ref = tower_ref(x, w1, b1, w2, b2)
    assert out.shape == (batch, 1)
    assert jnp.allclose(out, ref, atol=1e-5, rtol=1e-5)

    # --- Gridded case: B not a multiple of the tile, no x pad, partial last block. ---
    batch2 = 300
    x2 = jax.random.normal(kx2, (batch2, input_dim), jnp.float32)
    out2 = tower_net(x2, w1, b1, w2, b2)
    out2 = jax.block_until_ready(out2)
    ref2 = tower_ref(x2, w1, b1, w2, b2)
    assert out2.shape == (batch2, 1)
    assert jnp.allclose(out2, ref2, atol=1e-5, rtol=1e-5)

    # --- bf16 streaming path (halved HBM traffic for the dominant x stream). ---
    out3 = tower_net(x2, w1, b1, w2, b2, stream_bf16=True)
    out3 = jax.block_until_ready(out3)
    assert out3.shape == (batch2, 1)
    assert jnp.allclose(out3, ref2, atol=2e-2, rtol=2e-2)

    print("KERNEL_OK")
</pallas_src>

<mosaic_0001>
module attributes {stable_mosaic.version = 11 : i64} {
  func.func @tower_kernel(%arg0: i32, %arg1: memref<8x32xf32, #tpu.memory_space<vmem>>, %arg2: memref<32x32xf32, #tpu.memory_space<vmem>>, %arg3: memref<1x32xf32, #tpu.memory_space<vmem>>, %arg4: memref<1x32xf32, #tpu.memory_space<vmem>>, %arg5: memref<1xf32, #tpu.memory_space<smem>>, %arg6: memref<1x8xf32, #tpu.memory_space<vmem>>) attributes {dimension_semantics = [#tpu.dimension_semantics<parallel>], iteration_bounds = array<i64: 1>, scalar_prefetch = 0 : i64, scratch_operands = 0 : i64, tpu.core_type = #tpu.core_type<tc>, window_params = [{transform_indices = @transform_0, window_bounds = array<i64: 8, 32>}, {pipeline_mode = #tpu.pipeline_mode<synchronous>, transform_indices = @transform_1, window_bounds = array<i64: 32, 32>}, {pipeline_mode = #tpu.pipeline_mode<synchronous>, transform_indices = @transform_2, window_bounds = array<i64: 1, 32>}, {pipeline_mode = #tpu.pipeline_mode<synchronous>, transform_indices = @transform_3, window_bounds = array<i64: 1, 32>}, {transform_indices = @transform_4, window_bounds = array<i64: 1>}, {transform_indices = @transform_5, window_bounds = array<i64: 1, 8>}]} {
    %c0 = arith.constant 0 : index
    %c0_0 = arith.constant 0 : index
    %0 = vector.load %arg1[%c0, %c0_0] : memref<8x32xf32, #tpu.memory_space<vmem>>, vector<8x32xf32>
    %c0_1 = arith.constant 0 : index
    %c0_2 = arith.constant 0 : index
    %1 = vector.load %arg2[%c0_1, %c0_2] : memref<32x32xf32, #tpu.memory_space<vmem>>, vector<32x32xf32>
    %cst = arith.constant dense<0.000000e+00> : vector<8x32xf32>
    %2 = tpu.matmul %0, %1, %cst {dimension_numbers = #tpu.dot_dimension_numbers<[1], [0], [0], [1], [0, 0, 1, 1], [], []>} : vector<8x32xf32>, vector<32x32xf32>, vector<8x32xf32> -> vector<8x32xf32>
    %c0_3 = arith.constant 0 : index
    %c0_4 = arith.constant 0 : index
    %3 = vector.load %arg3[%c0_3, %c0_4] : memref<1x32xf32, #tpu.memory_space<vmem>>, vector<1x32xf32>
    %4 = vector.broadcast %3 : vector<1x32xf32> to vector<8x32xf32>
    %5 = arith.addf %2, %4 : vector<8x32xf32>
    %cst_5 = arith.constant 0.000000e+00 : f32
    %6 = vector.broadcast %cst_5 : f32 to vector<8x32xf32>
    %7 = arith.maximumf %5, %6 : vector<8x32xf32>
    %c0_6 = arith.constant 0 : index
    %c0_7 = arith.constant 0 : index
    %8 = vector.load %arg4[%c0_6, %c0_7] : memref<1x32xf32, #tpu.memory_space<vmem>>, vector<1x32xf32>
    %9 = vector.broadcast %8 : vector<1x32xf32> to vector<8x32xf32>
    %10 = arith.mulf %7, %9 : vector<8x32xf32>
    %cst_8 = arith.constant dense<0.000000e+00> : vector<8xf32>
    %11 = vector.multi_reduction <add>, %10, %cst_8 [1] : vector<8x32xf32> to vector<8xf32>
    %c0_9 = arith.constant 0 : index
    %12 = memref.load %arg5[%c0_9] : memref<1xf32, #tpu.memory_space<smem>>
    %13 = vector.broadcast %12 : f32 to vector<8xf32>
    %14 = arith.addf %11, %13 : vector<8xf32>
    %15 = arith.negf %14 : vector<8xf32>
    %16 = math.exp %15 : vector<8xf32>
    %cst_10 = arith.constant 1.000000e+00 : f32
    %17 = vector.broadcast %cst_10 : f32 to vector<8xf32>
    %18 = arith.addf %17, %16 : vector<8xf32>
    %19 = arith.divf %17, %18 : vector<8xf32>
    %20 = vector.shape_cast %19 : vector<8xf32> to vector<1x8xf32>
    %c0_11 = arith.constant 0 : index
    %c0_12 = arith.constant 0 : index
    %21 = vector.load %arg6[%c0_11, %c0_12] : memref<1x8xf32, #tpu.memory_space<vmem>>, vector<1x8xf32>
    tpu.vector_store %arg6[%c0_11, %c0_12], %20 {strides = array<i32>} : memref<1x8xf32, #tpu.memory_space<vmem>>, vector<1x8xf32>,
    return
  }
  func.func @transform_0(%arg0: i32) -> (i32, i32) {
    %c0_i32 = arith.constant 0 : i32
    %c0_i32_0 = arith.constant 0 : i32
    return %arg0, %c0_i32 : i32, i32
  }
  func.func @transform_1(%arg0: i32) -> (i32, i32) {
    %c0_i32 = arith.constant 0 : i32
    %c0_i32_0 = arith.constant 0 : i32
    %c0_i32_1 = arith.constant 0 : i32
    return %c0_i32, %c0_i32_0 : i32, i32
  }
  func.func @transform_2(%arg0: i32) -> (i32, i32) {
    %c0_i32 = arith.constant 0 : i32
    %c0_i32_0 = arith.constant 0 : i32
    %c0_i32_1 = arith.constant 0 : i32
    return %c0_i32, %c0_i32_0 : i32, i32
  }
  func.func @transform_3(%arg0: i32) -> (i32, i32) {
    %c0_i32 = arith.constant 0 : i32
    %c0_i32_0 = arith.constant 0 : i32
    %c0_i32_1 = arith.constant 0 : i32
    return %c0_i32, %c0_i32_0 : i32, i32
  }
  func.func @transform_4(%arg0: i32) -> i32 {
    %c0_i32 = arith.constant 0 : i32
    %c0_i32_0 = arith.constant 0 : i32
    return %c0_i32 : i32
  }
  func.func @transform_5(%arg0: i32) -> (i32, i32) {
    %c0_i32 = arith.constant 0 : i32
    %c0_i32_0 = arith.constant 0 : i32
    return %c0_i32, %arg0 : i32, i32
  }
}

</mosaic_0001>

<bundles_post_ra>
// kernel: tpu_custom_call.1
= control target key start
LH: loop header
LB: loop body
LE: loop exit
PB: predicated region body
PF: predicated region fallthrough
CT: control target
= control target key end

     0   :  { %11 = vsyncpa [#allocation4], 0  ;;  %s381_s0 = inlined_call_operand.hbm [shape: f32[8,32], index: 0, kind: input, shape index: {}]   ;;  %s382_s1 = inlined_call_operand.hbm [shape: f32[32,32], index: 1, kind: input, shape index: {}]   ;;  %s383_s2 = inlined_call_operand.vmem [shape: f32[1,32], index: 2, kind: input, shape index: {}]   ;;  %s384_s3 = inlined_call_operand.vmem [shape: f32[1,32], index: 3, kind: input, shape index: {}]   ;;  %s385_s4 = inlined_call_operand.<no memory space> [shape: f32[1], index: 4, kind: input, shape index: {}]   ;;  %s386_s5 = inlined_call_operand.hbm [shape: f32[1,8], index: 5, kind: output, shape index: {}]  }
   0x1   :  { %12 = vsyncpa [#allocation7], 0 }
   0x2   :  { %13 = vsyncpa [#allocation5], 0  ;;  %s291_s18 = smov [#allocation3]   ;;  %s292_s20 = smov [#allocation6]  }
   0x3   :  { %s20_s19 = sshll.u32 %s291_s18, 4  ;;  %s29_s21 = sshll.u32 %s292_s20, 4  ;;  %s21_s19 = int_to_ptr.vmem [resolvable:$true] %s20_s19  ;;  %s329_s21 = int_to_ptr.vmem [resolvable:$true] %s29_s21 }
   0x4   :  { %s219_s24 = scalar_lea.hbm %s381_s0, 128 }
   0x5   :  { %p220_p0 = scmp.ne.s32.totalorder %s381_s0, %s219_s24  ;;  %p223_p1 = scmp.lt.u32.totalorder %s219_s24, %s381_s0 }
   0x7   :  { %p225_p2 = pnand %p223_p1, %p220_p0 }
   0x9   :  { %228 = shalt.err (!%p225_p2)
}
   0xa   :  { %s229_s29 = scalar_lea.vmem %s21_s19, 128  ;;  %p234_p4 = scmp.lt.s32.totalorder %s21_s19, %s21_s19 }
   0xb   :  { %p230_p3 = scmp.ne.s32.totalorder %s21_s19, %s229_s29  ;;  %p235_p5 = scmp.lt.s32.totalorder %s229_s29, %s229_s29 }
   0xd   :  { %p236_p6 = por %p235_p5, %p234_p4 }
   0xf   :  { %p237_p7 = pnand %p236_p6, %p230_p3 }
  0x11   :  { %240 = shalt.err (!%p237_p7)
}
  0x12   :  { %23 = dma.hbm_to_vmem [thread:$0]  %s381_s0, 128, %s21_s19, [#allocation4]  }
  0x13   :  { %s241_s9 = scalar_lea.hbm %s382_s1, 512 }
  0x14   :  { %p242_p8 = scmp.ne.s32.totalorder %s382_s1, %s241_s9  ;;  %p245_p9 = scmp.lt.u32.totalorder %s241_s9, %s382_s1 }
  0x16   :  { %p247_p10 = pnand %p245_p9, %p242_p8 }
  0x18   :  { %250 = shalt.err (!%p247_p10)
}
  0x19   :  { %s251_s14 = scalar_lea.vmem %s329_s21, 512  ;;  %p256_p12 = scmp.lt.s32.totalorder %s329_s21, %s329_s21 }
  0x1a   :  { %p252_p11 = scmp.ne.s32.totalorder %s329_s21, %s251_s14  ;;  %p257_p13 = scmp.lt.s32.totalorder %s251_s14, %s251_s14 }
  0x1c   :  { %p258_p0 = por %p257_p13, %p256_p12 }
  0x1e   :  { %p259_p1 = pnand %p258_p0, %p252_p11 }
  0x20   :  { %262 = shalt.err (!%p259_p1)
}
  0x21   :  { %s293_s0 = smov 128   ;;  %s294_s15 = smov 8  }
  0x22   :  { %35 = dma.hbm_to_vmem [thread:$0]  %s382_s1, 512, %s329_s21, [#allocation7], %s293_s0, %s293_s0, %s294_s15  }
  0x23   :  { %285 = dma.done.wait [#allocation4], 128  }
  0x24   :  { %286 = vsyncadd [#allocation4], 4294967168 }
  0x25   :  { %287 = dma.done.wait [#allocation7], 512  }
  0x26   :  { %288 = vsyncadd [#allocation7], 4294966784  ;;  %v295_v0 = vmov 0.0|0.0   ;;  %vm296_vm0 = vmmov 0   ;;  %v297_v1 = vmov 0.0   ;;  %v49_v2 = vld [vmem:[#allocation6] sm:$0xff]  ;;  %v147_v17 = vstv %s385_s4 }
  0x27   :  { %201 = vmatprep.subr.bf16.mxu0 %v295_v0  ;;  %198 = vmatprep.mubr.msk.f32.mxu0 %vm296_vm0, %v297_v1  ;;  %v50_v3 = vld [vmem:[#allocation6 + $0x8] sm:$0xff]  ;;  %v51_v4 = vld [vmem:[#allocation6 + $0x10] sm:$0xff]  ;;  %v52_v6 = vld [vmem:[#allocation6 + $0x18] sm:$0xff]  ;;  %vm60_vm1 = vcmask 261120   ;;  %v156_v23 = vlaneseq  ;;  %vm163_vm2 = vcmask 57344  }
  0x28   :  { %v202_v5 = vpack.c.bf16 %v50_v3, %v49_v2  ;;  %v205_v7 = vpack.c.bf16 %v52_v6, %v51_v4  ;;  %v48_v8 = vld [vmem:[#allocation3] sm:$0xff] }
  0x29   :  { %v181_v9 = vld [vmem:[%s383_s2] ss:$0 sm:$0xff]  ;;  %v157_v24 = vand.u32 127, %v156_v23  ;;  %v159_v25 = vshrl.u32 %v156_v23, 7  ;;  %s298_s2 = smov [#allocation8]  }
  0x2a   :  { %203 = vmatpush3.bf16.msra.mxu0 %v202_v5  ;;  %v183_v13 = vld [vmem:[%s384_s3] ss:$0 sm:$0xff]  ;;  %s171_s3 = sshll.u32 %s298_s2, 4  ;;  %s172_s3 = int_to_ptr.vmem [resolvable:$true] %s171_s3 }
  0x2b   :  { %204 = vmatprep.subr.bf16.mxu0 %v295_v0  ;;  %v160_v26 = vsub.s32 %v157_v24, %v159_v25  ;;  %s263_s23 = scalar_lea.vmem %s172_s3, 16  ;;  %s267_s4 = scalar_lea.vmem %s172_s3, 32 }
  0x2c   :  { %p264_p2 = scmp.ne.s32.totalorder %s172_s3, %s263_s23  ;;  %p268_p3 = scmp.lt.s32.totalorder %s172_s3, %s172_s3 }
  0x2d   :  { %p269_p4 = scmp.lt.s32.totalorder %s267_s4, %s263_s23 }
  0x2e   :  { %206 = vmatpush3.bf16.msra.mxu0 %v205_v7 }
  0x2f   :  { %p270_p5 = por %p269_p4, %p268_p3 }
  0x31   :  { %199 = vmatmul.mubr.msk.f32.vlgmr.msra.gmra.mrb[0].mxu0 %vm60_vm1, %v48_v8  ;;  %p271_p6 = pnand %p270_p5, %p264_p2 }
 0x104   :  { %v130_v10 = vpop.f32.mrb[0].mxu0 }
 0x105   :  { %v131_v11 = vadd.f32 %v181_v9, %v130_v10  ;;  %v200_v12 = vpop.f32.mrb[1].mxu0 }
 0x107   :  { %v134_v14 = vmax.f32 %v131_v11, 0.0 }
 0x109   :  { %v142_v15 = vmul.f32 %v183_v13, %v134_v14 }
 0x10b   :  { %v143_v16 = vsel %vm60_vm1, %v142_v15, 0.0 }
 0x10c   :  { %144 = vadd.xlane.f32.xlu0 %v143_v16 }
 0x199   :  { %v145_v18 = vpop.xlane.xlu0 %144 }
 0x19a   :  { %v148_v19 = vadd.f32 %v147_v17, %v145_v18 }
 0x19c   :  { %v184_v20 = vmul.f32 -1.442695, %v148_v19 }
 0x19e   :  { %215 = vpow2.f32 %v184_v20 }
 0x1a8   :  { %v216_v21 = vpop.eup %215 }
 0x1a9   :  { %v152_v22 = vadd.f32 1.0, %v216_v21 }
 0x1ab   :  { %217 = vrcp.f32 %v152_v22 }
 0x1b5   :  { %v218_v27 = vpop.eup %217 }
 0x1b6   :  { %v161_v28 = vrot.slane %v218_v27, %v160_v26 }
 0x1b8   :  { %164 = vst.msk [vmem:[#allocation8] sm:$0x1] %vm163_vm2, %v161_v28 }
 0x1b9   :  { %274 = shalt.err (!%p271_p6)
}
 0x1ba   :  { %s275_s26 = scalar_lea.hbm %s386_s5, 16 }
 0x1bb   :  { %p276_p7 = scmp.ne.s32.totalorder %s386_s5, %s275_s26  ;;  %p279_p8 = scmp.lt.u32.totalorder %s275_s26, %s386_s5 }
 0x1bd   :  { %p281_p9 = pnand %p279_p8, %p276_p7 }
 0x1bf   :  { %284 = shalt.err (!%p281_p9)
}
 0x1c0   :  { %174 = dma.vmem_to_hbm [thread:$0]  %s172_s3, 16, %s386_s5, [#allocation5]  }
 0x1c1   :  { %289 = dma.done.wait [#allocation5], 16  }
 0x1c2   :  { %290 = vsyncadd [#allocation5], 4294967280 }
 0x1c3   :  { %178 = vsyncpa [#allocation4], 1 }
 0x1c4   :  { %179 = vsyncpa [#allocation7], 1 }
 0x1c5   :  { %180 = vsyncpa [#allocation5], 1 }

</bundles_post_ra>
